<compile_context>
chip_gen: v5e
topology: v5e:2x2
jax: 0.10.0
libtpu: 0.0.40
codegen_flags: <defaults>
</compile_context>

<pallas_src>
import functools

import jax
import jax.numpy as jnp
from jax import lax
from jax.experimental import pallas as pl
from jax.experimental.pallas import tpu as pltpu  # noqa: F401  (kept for TPU params if needed)


def _actor_kernel(obs_ref, w0_ref, w1_ref, wfc_ref, out_ref,
                  *, n_nodes, action_dim, log_std_min, log_std_max):
    B = obs_ref.shape[1]
    out_cols = 3 * action_dim

    # Per-lane column masks, hoisted out of the node loop (built once).
    col = lax.broadcasted_iota(jnp.int32, (B, out_cols), 1)
    is_mu = col < action_dim
    is_std = jnp.logical_and(col >= action_dim, col < 2 * action_dim)

    # Small, fully unrolled node loop: one invocation, back-to-back MXU work.
    for n in range(n_nodes):
        x = obs_ref[n]                                           # (B, obs_dim)
        h = jnp.maximum(
            jnp.dot(x, w0_ref[n], preferred_element_type=jnp.float32), 0.0)
        h = jnp.maximum(
            jnp.dot(h, w1_ref[n], preferred_element_type=jnp.float32), 0.0)
        # wfc[n] = [wf_mu | wf_std | wf_mu]  (built host-side), so:
        #   y[:, 0:A)   = mu
        #   y[:, A:2A)  = pre-tanh log_std
        #   y[:, 2A:3A) = mu again (tanh of it == SquashedNormal mean)
        y = jnp.dot(h, wfc_ref[n], preferred_element_type=jnp.float32)

        t = jnp.tanh(y)                                          # EUP
        log_std = log_std_min + 0.5 * (log_std_max - log_std_min) * (t + 1.0)
        std = jnp.exp(log_std)                                   # EUP
        # Per-lane select: mu | std | tanh(mu). No unaligned lane slices.
        out_ref[n] = jnp.where(is_mu, y, jnp.where(is_std, std, t))


def network_diag_gaussian_actor(obs, w0, w1, wf, *, action_dim, log_std_bounds):
    """obs: (N, B, obs_dim); w0: (N, obs_dim, H); w1: (N, H, H); wf: (N, H, 2*A).

    Returns (mu, std, dist_mean) each of shape (N, B, action_dim).
    """
    N, B, obs_dim = obs.shape
    lo, hi = log_std_bounds

    # Host-side weight rearrangement so the kernel never slices at an
    # unaligned lane offset: last matmul emits [mu | pre_log_std | mu].
    wf_mu = wf[..., :action_dim]
    wf_std = wf[..., action_dim:]
    wfc = jnp.concatenate([wf_mu, wf_std, wf_mu], axis=-1)       # (N, H, 3A)

    kernel = functools.partial(
        _actor_kernel,
        n_nodes=N,
        action_dim=action_dim,
        log_std_min=float(lo),
        log_std_max=float(hi),
    )

    # Single invocation, no grid: all operands fit trivially in VMEM on
    # v5e / v6e / v7x; one input DMA per array, one fused output DMA.
    fused = pl.pallas_call(
        kernel,
        out_shape=jax.ShapeDtypeStruct((N, B, 3 * action_dim), jnp.float32),
    )(obs, w0, w1, wfc)

    mu = fused[..., :action_dim]
    std = fused[..., action_dim:2 * action_dim]
    mean = fused[..., 2 * action_dim:]
    return mu, std, mean


def _init_params(key, N, obs_dim, hidden_dim, action_dim):
    """Deterministic init mirroring init_trunk_layers: uniform in [-1/out, 1/out]."""
    out_dim = 2 * action_dim
    k0, k1, k2 = jax.random.split(key, 3)
    w0 = jax.random.uniform(k0, (N, obs_dim, hidden_dim),
                            minval=-1.0 / hidden_dim, maxval=1.0 / hidden_dim,
                            dtype=jnp.float32)
    w1 = jax.random.uniform(k1, (N, hidden_dim, hidden_dim),
                            minval=-1.0 / hidden_dim, maxval=1.0 / hidden_dim,
                            dtype=jnp.float32)
    wf = jax.random.uniform(k2, (N, hidden_dim, out_dim),
                            minval=-1.0 / out_dim, maxval=1.0 / out_dim,
                            dtype=jnp.float32)
    return w0, w1, wf


def _reference(obs, w0, w1, wf, action_dim, log_std_bounds):
    # Plain-JAX reference for a sanity check.
    h = jnp.maximum(jnp.einsum('nbi,nih->nbh', obs, w0), 0.0)
    h = jnp.maximum(jnp.einsum('nbh,nhk->nbk', h, w1), 0.0)
    y = jnp.einsum('nbh,nho->nbo', h, wf)
    mu, log_std = y[..., :action_dim], y[..., action_dim:]
    lo, hi = log_std_bounds
    log_std = jnp.tanh(log_std)
    log_std = lo + 0.5 * (hi - lo) * (log_std + 1.0)
    return mu, jnp.exp(log_std), jnp.tanh(mu)


if __name__ == "__main__":
    # Small, module-consistent shapes.
    N = 4            # number of networked nodes/agents
    B = 8            # batch of observations per node
    obs_dim = 16
    hidden_dim = 32
    action_dim = 4
    log_std_bounds = (-10.0, 2.0)

    key = jax.random.PRNGKey(0)
    k_obs, k_par = jax.random.split(key)
    obs = jax.random.normal(k_obs, (N, B, obs_dim), dtype=jnp.float32)
    w0, w1, wf = _init_params(k_par, N, obs_dim, hidden_dim, action_dim)

    mu, std, mean = network_diag_gaussian_actor(
        obs, w0, w1, wf, action_dim=action_dim, log_std_bounds=log_std_bounds)
    jax.block_until_ready((mu, std, mean))

    mu_r, std_r, mean_r = _reference(obs, w0, w1, wf, action_dim, log_std_bounds)
    assert jnp.allclose(mu, mu_r, atol=1e-5), "mu mismatch"
    assert jnp.allclose(std, std_r, atol=1e-5), "std mismatch"
    assert jnp.allclose(mean, mean_r, atol=1e-5), "mean mismatch"

    print("KERNEL_OK")
</pallas_src>

<mosaic_0001>
module attributes {stable_mosaic.version = 11 : i64} {
  func.func @_actor_kernel(%arg0: memref<4x8x16xf32, #tpu.memory_space<vmem>>, %arg1: memref<4x16x32xf32, #tpu.memory_space<vmem>>, %arg2: memref<4x32x32xf32, #tpu.memory_space<vmem>>, %arg3: memref<4x32x12xf32, #tpu.memory_space<vmem>>, %arg4: memref<4x8x12xf32, #tpu.memory_space<vmem>>) attributes {dimension_semantics = [], scalar_prefetch = 0 : i64, scratch_operands = 0 : i64, tpu.core_type = #tpu.core_type<tc>} {
    %0 = tpu.iota {dimensions = array<i32: 1>} : vector<8x12xi32>
    %c4_i32 = arith.constant 4 : i32
    %1 = vector.broadcast %c4_i32 : i32 to vector<8x12xi32>
    %2 = arith.cmpi slt, %0, %1 : vector<8x12xi32>
    %c4_i32_0 = arith.constant 4 : i32
    %3 = vector.broadcast %c4_i32_0 : i32 to vector<8x12xi32>
    %4 = arith.cmpi sge, %0, %3 : vector<8x12xi32>
    %c8_i32 = arith.constant 8 : i32
    %5 = vector.broadcast %c8_i32 : i32 to vector<8x12xi32>
    %6 = arith.cmpi slt, %0, %5 : vector<8x12xi32>
    %7 = arith.andi %4, %6 : vector<8x12xi1>
    %c0 = arith.constant 0 : index
    %c0_1 = arith.constant 0 : index
    %c0_2 = arith.constant 0 : index
    %8 = vector.load %arg0[%c0, %c0_1, %c0_2] : memref<4x8x16xf32, #tpu.memory_space<vmem>>, vector<1x8x16xf32>
    %9 = vector.shape_cast %8 : vector<1x8x16xf32> to vector<8x16xf32>
    %c0_3 = arith.constant 0 : index
    %c0_4 = arith.constant 0 : index
    %c0_5 = arith.constant 0 : index
    %10 = vector.load %arg1[%c0_3, %c0_4, %c0_5] : memref<4x16x32xf32, #tpu.memory_space<vmem>>, vector<1x16x32xf32>
    %11 = vector.shape_cast %10 : vector<1x16x32xf32> to vector<16x32xf32>
    %cst = arith.constant dense<0.000000e+00> : vector<8x32xf32>
    %12 = tpu.matmul %9, %11, %cst {dimension_numbers = #tpu.dot_dimension_numbers<[1], [0], [0], [1], [0, 0, 1, 1], [], []>} : vector<8x16xf32>, vector<16x32xf32>, vector<8x32xf32> -> vector<8x32xf32>
    %cst_6 = arith.constant 0.000000e+00 : f32
    %13 = vector.broadcast %cst_6 : f32 to vector<8x32xf32>
    %14 = arith.maximumf %12, %13 : vector<8x32xf32>
    %c0_7 = arith.constant 0 : index
    %c0_8 = arith.constant 0 : index
    %c0_9 = arith.constant 0 : index
    %15 = vector.load %arg2[%c0_7, %c0_8, %c0_9] : memref<4x32x32xf32, #tpu.memory_space<vmem>>, vector<1x32x32xf32>
    %16 = vector.shape_cast %15 : vector<1x32x32xf32> to vector<32x32xf32>
    %cst_10 = arith.constant dense<0.000000e+00> : vector<8x32xf32>
    %17 = tpu.matmul %14, %16, %cst_10 {dimension_numbers = #tpu.dot_dimension_numbers<[1], [0], [0], [1], [0, 0, 1, 1], [], []>} : vector<8x32xf32>, vector<32x32xf32>, vector<8x32xf32> -> vector<8x32xf32>
    %cst_11 = arith.constant 0.000000e+00 : f32
    %18 = vector.broadcast %cst_11 : f32 to vector<8x32xf32>
    %19 = arith.maximumf %17, %18 : vector<8x32xf32>
    %c0_12 = arith.constant 0 : index
    %c0_13 = arith.constant 0 : index
    %c0_14 = arith.constant 0 : index
    %20 = vector.load %arg3[%c0_12, %c0_13, %c0_14] : memref<4x32x12xf32, #tpu.memory_space<vmem>>, vector<1x32x12xf32>
    %21 = vector.shape_cast %20 : vector<1x32x12xf32> to vector<32x12xf32>
    %cst_15 = arith.constant dense<0.000000e+00> : vector<8x12xf32>
    %22 = tpu.matmul %19, %21, %cst_15 {dimension_numbers = #tpu.dot_dimension_numbers<[1], [0], [0], [1], [0, 0, 1, 1], [], []>} : vector<8x32xf32>, vector<32x12xf32>, vector<8x12xf32> -> vector<8x12xf32>
    %23 = math.tanh %22 : vector<8x12xf32>
    %cst_16 = arith.constant 1.000000e+00 : f32
    %24 = vector.broadcast %cst_16 : f32 to vector<8x12xf32>
    %25 = arith.addf %23, %24 : vector<8x12xf32>
    %cst_17 = arith.constant 6.000000e+00 : f32
    %26 = vector.broadcast %cst_17 : f32 to vector<8x12xf32>
    %27 = arith.mulf %26, %25 : vector<8x12xf32>
    %cst_18 = arith.constant -1.000000e+01 : f32
    %28 = vector.broadcast %cst_18 : f32 to vector<8x12xf32>
    %29 = arith.addf %28, %27 : vector<8x12xf32>
    %30 = math.exp %29 : vector<8x12xf32>
    %31 = arith.select %7, %30, %23 : vector<8x12xi1>, vector<8x12xf32>
    %32 = arith.select %2, %22, %31 : vector<8x12xi1>, vector<8x12xf32>
    %c0_19 = arith.constant 0 : index
    %c0_20 = arith.constant 0 : index
    %c0_21 = arith.constant 0 : index
    %33 = vector.load %arg4[%c0_19, %c0_20, %c0_21] : memref<4x8x12xf32, #tpu.memory_space<vmem>>, vector<1x8x12xf32>
    %34 = vector.shape_cast %33 : vector<1x8x12xf32> to vector<8x12xf32>
    %35 = vector.shape_cast %32 : vector<8x12xf32> to vector<1x8x12xf32>
    tpu.vector_store %arg4[%c0_19, %c0_20, %c0_21], %35 {strides = array<i32>} : memref<4x8x12xf32, #tpu.memory_space<vmem>>, vector<1x8x12xf32>,
    %c1 = arith.constant 1 : index
    %c0_22 = arith.constant 0 : index
    %c0_23 = arith.constant 0 : index
    %36 = vector.load %arg0[%c1, %c0_22, %c0_23] : memref<4x8x16xf32, #tpu.memory_space<vmem>>, vector<1x8x16xf32>
    %37 = vector.shape_cast %36 : vector<1x8x16xf32> to vector<8x16xf32>
    %c1_24 = arith.constant 1 : index
    %c0_25 = arith.constant 0 : index
    %c0_26 = arith.constant 0 : index
    %38 = vector.load %arg1[%c1_24, %c0_25, %c0_26] : memref<4x16x32xf32, #tpu.memory_space<vmem>>, vector<1x16x32xf32>
    %39 = vector.shape_cast %38 : vector<1x16x32xf32> to vector<16x32xf32>
    %cst_27 = arith.constant dense<0.000000e+00> : vector<8x32xf32>
    %40 = tpu.matmul %37, %39, %cst_27 {dimension_numbers = #tpu.dot_dimension_numbers<[1], [0], [0], [1], [0, 0, 1, 1], [], []>} : vector<8x16xf32>, vector<16x32xf32>, vector<8x32xf32> -> vector<8x32xf32>
    %cst_28 = arith.constant 0.000000e+00 : f32
    %41 = vector.broadcast %cst_28 : f32 to vector<8x32xf32>
    %42 = arith.maximumf %40, %41 : vector<8x32xf32>
    %c1_29 = arith.constant 1 : index
    %c0_30 = arith.constant 0 : index
    %c0_31 = arith.constant 0 : index
    %43 = vector.load %arg2[%c1_29, %c0_30, %c0_31] : memref<4x32x32xf32, #tpu.memory_space<vmem>>, vector<1x32x32xf32>
    %44 = vector.shape_cast %43 : vector<1x32x32xf32> to vector<32x32xf32>
    %cst_32 = arith.constant dense<0.000000e+00> : vector<8x32xf32>
    %45 = tpu.matmul %42, %44, %cst_32 {dimension_numbers = #tpu.dot_dimension_numbers<[1], [0], [0], [1], [0, 0, 1, 1], [], []>} : vector<8x32xf32>, vector<32x32xf32>, vector<8x32xf32> -> vector<8x32xf32>
    %cst_33 = arith.constant 0.000000e+00 : f32
    %46 = vector.broadcast %cst_33 : f32 to vector<8x32xf32>
    %47 = arith.maximumf %45, %46 : vector<8x32xf32>
    %c1_34 = arith.constant 1 : index
    %c0_35 = arith.constant 0 : index
    %c0_36 = arith.constant 0 : index
    %48 = vector.load %arg3[%c1_34, %c0_35, %c0_36] : memref<4x32x12xf32, #tpu.memory_space<vmem>>, vector<1x32x12xf32>
    %49 = vector.shape_cast %48 : vector<1x32x12xf32> to vector<32x12xf32>
    %cst_37 = arith.constant dense<0.000000e+00> : vector<8x12xf32>
    %50 = tpu.matmul %47, %49, %cst_37 {dimension_numbers = #tpu.dot_dimension_numbers<[1], [0], [0], [1], [0, 0, 1, 1], [], []>} : vector<8x32xf32>, vector<32x12xf32>, vector<8x12xf32> -> vector<8x12xf32>
    %51 = math.tanh %50 : vector<8x12xf32>
    %cst_38 = arith.constant 1.000000e+00 : f32
    %52 = vector.broadcast %cst_38 : f32 to vector<8x12xf32>
    %53 = arith.addf %51, %52 : vector<8x12xf32>
    %cst_39 = arith.constant 6.000000e+00 : f32
    %54 = vector.broadcast %cst_39 : f32 to vector<8x12xf32>
    %55 = arith.mulf %54, %53 : vector<8x12xf32>
    %cst_40 = arith.constant -1.000000e+01 : f32
    %56 = vector.broadcast %cst_40 : f32 to vector<8x12xf32>
    %57 = arith.addf %56, %55 : vector<8x12xf32>
    %58 = math.exp %57 : vector<8x12xf32>
    %59 = arith.select %7, %58, %51 : vector<8x12xi1>, vector<8x12xf32>
    %60 = arith.select %2, %50, %59 : vector<8x12xi1>, vector<8x12xf32>
    %c1_41 = arith.constant 1 : index
    %c0_42 = arith.constant 0 : index
    %c0_43 = arith.constant 0 : index
    %61 = vector.load %arg4[%c1_41, %c0_42, %c0_43] : memref<4x8x12xf32, #tpu.memory_space<vmem>>, vector<1x8x12xf32>
    %62 = vector.shape_cast %61 : vector<1x8x12xf32> to vector<8x12xf32>
    %63 = vector.shape_cast %60 : vector<8x12xf32> to vector<1x8x12xf32>
    tpu.vector_store %arg4[%c1_41, %c0_42, %c0_43], %63 {strides = array<i32>} : memref<4x8x12xf32, #tpu.memory_space<vmem>>, vector<1x8x12xf32>,
    %c2 = arith.constant 2 : index
    %c0_44 = arith.constant 0 : index
    %c0_45 = arith.constant 0 : index
    %64 = vector.load %arg0[%c2, %c0_44, %c0_45] : memref<4x8x16xf32, #tpu.memory_space<vmem>>, vector<1x8x16xf32>
    %65 = vector.shape_cast %64 : vector<1x8x16xf32> to vector<8x16xf32>
    %c2_46 = arith.constant 2 : index
    %c0_47 = arith.constant 0 : index
    %c0_48 = arith.constant 0 : index
    %66 = vector.load %arg1[%c2_46, %c0_47, %c0_48] : memref<4x16x32xf32, #tpu.memory_space<vmem>>, vector<1x16x32xf32>
    %67 = vector.shape_cast %66 : vector<1x16x32xf32> to vector<16x32xf32>
    %cst_49 = arith.constant dense<0.000000e+00> : vector<8x32xf32>
    %68 = tpu.matmul %65, %67, %cst_49 {dimension_numbers = #tpu.dot_dimension_numbers<[1], [0], [0], [1], [0, 0, 1, 1], [], []>} : vector<8x16xf32>, vector<16x32xf32>, vector<8x32xf32> -> vector<8x32xf32>
    %cst_50 = arith.constant 0.000000e+00 : f32
    %69 = vector.broadcast %cst_50 : f32 to vector<8x32xf32>
    %70 = arith.maximumf %68, %69 : vector<8x32xf32>
    %c2_51 = arith.constant 2 : index
    %c0_52 = arith.constant 0 : index
    %c0_53 = arith.constant 0 : index
    %71 = vector.load %arg2[%c2_51, %c0_52, %c0_53] : memref<4x32x32xf32, #tpu.memory_space<vmem>>, vector<1x32x32xf32>
    %72 = vector.shape_cast %71 : vector<1x32x32xf32> to vector<32x32xf32>
    %cst_54 = arith.constant dense<0.000000e+00> : vector<8x32xf32>
    %73 = tpu.matmul %70, %72, %cst_54 {dimension_numbers = #tpu.dot_dimension_numbers<[1], [0], [0], [1], [0, 0, 1, 1], [], []>} : vector<8x32xf32>, vector<32x32xf32>, vector<8x32xf32> -> vector<8x32xf32>
    %cst_55 = arith.constant 0.000000e+00 : f32
    %74 = vector.broadcast %cst_55 : f32 to vector<8x32xf32>
    %75 = arith.maximumf %73, %74 : vector<8x32xf32>
    %c2_56 = arith.constant 2 : index
    %c0_57 = arith.constant 0 : index
    %c0_58 = arith.constant 0 : index
    %76 = vector.load %arg3[%c2_56, %c0_57, %c0_58] : memref<4x32x12xf32, #tpu.memory_space<vmem>>, vector<1x32x12xf32>
    %77 = vector.shape_cast %76 : vector<1x32x12xf32> to vector<32x12xf32>
    %cst_59 = arith.constant dense<0.000000e+00> : vector<8x12xf32>
    %78 = tpu.matmul %75, %77, %cst_59 {dimension_numbers = #tpu.dot_dimension_numbers<[1], [0], [0], [1], [0, 0, 1, 1], [], []>} : vector<8x32xf32>, vector<32x12xf32>, vector<8x12xf32> -> vector<8x12xf32>
    %79 = math.tanh %78 : vector<8x12xf32>
    %cst_60 = arith.constant 1.000000e+00 : f32
    %80 = vector.broadcast %cst_60 : f32 to vector<8x12xf32>
    %81 = arith.addf %79, %80 : vector<8x12xf32>
    %cst_61 = arith.constant 6.000000e+00 : f32
    %82 = vector.broadcast %cst_61 : f32 to vector<8x12xf32>
    %83 = arith.mulf %82, %81 : vector<8x12xf32>
    %cst_62 = arith.constant -1.000000e+01 : f32
    %84 = vector.broadcast %cst_62 : f32 to vector<8x12xf32>
    %85 = arith.addf %84, %83 : vector<8x12xf32>
    %86 = math.exp %85 : vector<8x12xf32>
    %87 = arith.select %7, %86, %79 : vector<8x12xi1>, vector<8x12xf32>
    %88 = arith.select %2, %78, %87 : vector<8x12xi1>, vector<8x12xf32>
    %c2_63 = arith.constant 2 : index
    %c0_64 = arith.constant 0 : index
    %c0_65 = arith.constant 0 : index
    %89 = vector.load %arg4[%c2_63, %c0_64, %c0_65] : memref<4x8x12xf32, #tpu.memory_space<vmem>>, vector<1x8x12xf32>
    %90 = vector.shape_cast %89 : vector<1x8x12xf32> to vector<8x12xf32>
    %91 = vector.shape_cast %88 : vector<8x12xf32> to vector<1x8x12xf32>
    tpu.vector_store %arg4[%c2_63, %c0_64, %c0_65], %91 {strides = array<i32>} : memref<4x8x12xf32, #tpu.memory_space<vmem>>, vector<1x8x12xf32>,
    %c3 = arith.constant 3 : index
    %c0_66 = arith.constant 0 : index
    %c0_67 = arith.constant 0 : index
    %92 = vector.load %arg0[%c3, %c0_66, %c0_67] : memref<4x8x16xf32, #tpu.memory_space<vmem>>, vector<1x8x16xf32>
    %93 = vector.shape_cast %92 : vector<1x8x16xf32> to vector<8x16xf32>
    %c3_68 = arith.constant 3 : index
    %c0_69 = arith.constant 0 : index
    %c0_70 = arith.constant 0 : index
    %94 = vector.load %arg1[%c3_68, %c0_69, %c0_70] : memref<4x16x32xf32, #tpu.memory_space<vmem>>, vector<1x16x32xf32>
    %95 = vector.shape_cast %94 : vector<1x16x32xf32> to vector<16x32xf32>
    %cst_71 = arith.constant dense<0.000000e+00> : vector<8x32xf32>
    %96 = tpu.matmul %93, %95, %cst_71 {dimension_numbers = #tpu.dot_dimension_numbers<[1], [0], [0], [1], [0, 0, 1, 1], [], []>} : vector<8x16xf32>, vector<16x32xf32>, vector<8x32xf32> -> vector<8x32xf32>
    %cst_72 = arith.constant 0.000000e+00 : f32
    %97 = vector.broadcast %cst_72 : f32 to vector<8x32xf32>
    %98 = arith.maximumf %96, %97 : vector<8x32xf32>
    %c3_73 = arith.constant 3 : index
    %c0_74 = arith.constant 0 : index
    %c0_75 = arith.constant 0 : index
    %99 = vector.load %arg2[%c3_73, %c0_74, %c0_75] : memref<4x32x32xf32, #tpu.memory_space<vmem>>, vector<1x32x32xf32>
    %100 = vector.shape_cast %99 : vector<1x32x32xf32> to vector<32x32xf32>
    %cst_76 = arith.constant dense<0.000000e+00> : vector<8x32xf32>
    %101 = tpu.matmul %98, %100, %cst_76 {dimension_numbers = #tpu.dot_dimension_numbers<[1], [0], [0], [1], [0, 0, 1, 1], [], []>} : vector<8x32xf32>, vector<32x32xf32>, vector<8x32xf32> -> vector<8x32xf32>
    %cst_77 = arith.constant 0.000000e+00 : f32
    %102 = vector.broadcast %cst_77 : f32 to vector<8x32xf32>
    %103 = arith.maximumf %101, %102 : vector<8x32xf32>
    %c3_78 = arith.constant 3 : index
    %c0_79 = arith.constant 0 : index
    %c0_80 = arith.constant 0 : index
    %104 = vector.load %arg3[%c3_78, %c0_79, %c0_80] : memref<4x32x12xf32, #tpu.memory_space<vmem>>, vector<1x32x12xf32>
    %105 = vector.shape_cast %104 : vector<1x32x12xf32> to vector<32x12xf32>
    %cst_81 = arith.constant dense<0.000000e+00> : vector<8x12xf32>
    %106 = tpu.matmul %103, %105, %cst_81 {dimension_numbers = #tpu.dot_dimension_numbers<[1], [0], [0], [1], [0, 0, 1, 1], [], []>} : vector<8x32xf32>, vector<32x12xf32>, vector<8x12xf32> -> vector<8x12xf32>
    %107 = math.tanh %106 : vector<8x12xf32>
    %cst_82 = arith.constant 1.000000e+00 : f32
    %108 = vector.broadcast %cst_82 : f32 to vector<8x12xf32>
    %109 = arith.addf %107, %108 : vector<8x12xf32>
    %cst_83 = arith.constant 6.000000e+00 : f32
    %110 = vector.broadcast %cst_83 : f32 to vector<8x12xf32>
    %111 = arith.mulf %110, %109 : vector<8x12xf32>
    %cst_84 = arith.constant -1.000000e+01 : f32
    %112 = vector.broadcast %cst_84 : f32 to vector<8x12xf32>
    %113 = arith.addf %112, %111 : vector<8x12xf32>
    %114 = math.exp %113 : vector<8x12xf32>
    %115 = arith.select %7, %114, %107 : vector<8x12xi1>, vector<8x12xf32>
    %116 = arith.select %2, %106, %115 : vector<8x12xi1>, vector<8x12xf32>
    %c3_85 = arith.constant 3 : index
    %c0_86 = arith.constant 0 : index
    %c0_87 = arith.constant 0 : index
    %117 = vector.load %arg4[%c3_85, %c0_86, %c0_87] : memref<4x8x12xf32, #tpu.memory_space<vmem>>, vector<1x8x12xf32>
    %118 = vector.shape_cast %117 : vector<1x8x12xf32> to vector<8x12xf32>
    %119 = vector.shape_cast %116 : vector<8x12xf32> to vector<1x8x12xf32>
    tpu.vector_store %arg4[%c3_85, %c0_86, %c0_87], %119 {strides = array<i32>} : memref<4x8x12xf32, #tpu.memory_space<vmem>>, vector<1x8x12xf32>,
    return
  }
}

</mosaic_0001>

<bundles_post_ra>
// kernel: tpu_custom_call.1
= control target key start
LH: loop header
LB: loop body
LE: loop exit
PB: predicated region body
PF: predicated region fallthrough
CT: control target
= control target key end

     0   :  { %9 = vsyncpa [#allocation3], 0  ;;  %s733_s0 = inlined_call_operand.vmem [shape: f32[4,8,16], index: 0, kind: input, shape index: {}]   ;;  %s734_s1 = inlined_call_operand.hbm [shape: f32[4,16,32], index: 1, kind: input, shape index: {}]   ;;  %s735_s2 = inlined_call_operand.vmem [shape: f32[4,32,32], index: 2, kind: input, shape index: {}]   ;;  %s736_s3 = inlined_call_operand.vmem [shape: f32[4,32,12], index: 3, kind: input, shape index: {}]   ;;  %s737_s4 = inlined_call_operand.hbm [shape: f32[4,8,12], index: 4, kind: output, shape index: {}]  }
   0x1   :  { %10 = vsyncpa [#allocation4], 0  ;;  %s17_s17 = sshll.u32 %s734_s1, 4  ;;  %s552_s18 = smov [#allocation2]   ;;  %s18_s17 = int_to_ptr.hbm [resolvable:$true] %s17_s17 }
   0x2   :  { %s19_s19 = sshll.u32 %s552_s18, 4  ;;  %s553_s20 = smov 128   ;;  %s20_s19 = int_to_ptr.vmem [resolvable:$true] %s19_s19 }
   0x3   :  { %s554_s21 = smov 8  }
   0x4   :  { %25 = dma.hbm_to_vmem [thread:$0]  %s18_s17, 1024, %s20_s19, [#allocation3], %s553_s20, %s553_s20, %s554_s21  }
   0x5   :  { %548 = dma.done.wait [#allocation3], 1024  }
   0x6   :  { %549 = vsyncadd [#allocation3], 4294966272  ;;  %v138_v0 = vld [vmem:[#allocation2 + $0x18] sm:$0xff]  ;;  %v137_v1 = vld [vmem:[#allocation2 + $0x10] sm:$0xff]  ;;  %vm43_vm0 = vcmask 130048   ;;  %vm72_vm1 = vcmask 261120   ;;  %v34_v60 = vlaneseq }
   0x7   :  { %156 = vmatpush.msra.mxu3 %v138_v0  ;;  %v444_v2 = vld [vmem:[%s733_s0 + $0x8] sm:$0xff]  ;;  %v41_v4 = vld [vmem:[#allocation2] sm:$0xff]  ;;  %v449_v6 = vld [vmem:[%s735_s2 + $0x38] sm:$0xff]  ;;  %vm132_vm6 = vcmask 97280   ;;  %s428_s18 = sshll.u32 %s737_s4, 4  ;;  %s429_s18 = int_to_ptr.hbm [resolvable:$true] %s428_s18 }
   0x8   :  { %v42_v3 = vld [vmem:[#allocation2 + $0x8] sm:$0xff]  ;;  %v40_v5 = vld [vmem:[%s733_s0] sm:$0xff]  ;;  %v448_v7 = vld [vmem:[%s735_s2 + $0x30] sm:$0xff] }
   0x9   :  { %61 = vmatpush.msra.mxu0 %v42_v3  ;;  %157 = vmatpush.msra.mxu3 %v137_v1  ;;  %v447_v8 = vld [vmem:[%s735_s2 + $0x28] sm:$0xff]  ;;  %v446_v9 = vld [vmem:[%s735_s2 + $0x20] sm:$0xff]  ;;  %v71_v10 = vld [vmem:[%s735_s2 + $0x18] sm:$0xff]  ;;  %v35_v3 = vand.u32 127, %v34_v60 }
   0xa   :  { %445 = vmatmul.msk.f32.vlgmr.msra.gmra.mxu3 %vm43_vm0, %v444_v2  ;;  %v70_v11 = vld [vmem:[%s735_s2 + $0x10] sm:$0xff]  ;;  %88 = vmatpush.msra.mxu1 %v71_v10  ;;  %v69_v12 = vld [vmem:[%s735_s2 + $0x8] sm:$0xff]  ;;  %v454_v13 = vld [vmem:[%s736_s3 + $0x38] sm:$0xff] }
   0xb   :  { %62 = vmatpush.msra.mxu0 %v41_v4  ;;  %v453_v14 = vld [vmem:[%s736_s3 + $0x30] sm:$0xff]  ;;  %v68_v15 = vld [vmem:[%s735_s2] sm:$0xff]  ;;  %212 = vmatpush.msrb.mxu3 %v454_v13  ;;  %v234_v16 = vld [vmem:[#allocation2 + $0x28] sm:$0xff]  ;;  %vm37_vm2 = vcmp.ge.s32.totalorder %v35_v3, 4  ;;  %vm38_vm3 = vcmp.lt.s32.totalorder %v35_v3, 8  ;;  %vm36_vm5 = vcmp.lt.s32.totalorder %v35_v3, 4 }
   0xc   :  { %441 = vmatmul.msk.f32.vlgmr.msra.gmra.mxu0 %vm43_vm0, %v40_v5  ;;  %89 = vmatpush.msra.mxu1 %v70_v11  ;;  %v452_v17 = vld [vmem:[%s736_s3 + $0x28] sm:$0xff]  ;;  %v233_v18 = vld [vmem:[#allocation2 + $0x20] sm:$0xff]  ;;  %v456_v23 = vld [vmem:[%s733_s0 + $0x10] sm:$0xff] }
   0xd   :  { %183 = vmatpush.msrb.mxu0 %v449_v6  ;;  %213 = vmatpush.msrb.mxu3 %v453_v14  ;;  %v451_v24 = vld [vmem:[%s736_s3 + $0x20] sm:$0xff]  ;;  %v330_v25 = vld [vmem:[#allocation2 + $0x38] sm:$0xff]  ;;  %v329_v26 = vld [vmem:[#allocation2 + $0x30] sm:$0xff] }
   0xe   :  { %90 = vmatpush.msra.mxu1 %v69_v12  ;;  %v100_v27 = vld [vmem:[%s736_s3 + $0x18] sm:$0xff]  ;;  %v99_v28 = vld [vmem:[%s736_s3 + $0x10] sm:$0xff]  ;;  %v98_v29 = vld [vmem:[%s736_s3 + $0x8] sm:$0xff] }
   0xf   :  { %184 = vmatpush.msrb.mxu0 %v448_v7  ;;  %214 = vmatpush.msrb.mxu3 %v452_v17  ;;  %v97_v30 = vld [vmem:[%s736_s3] sm:$0xff]  ;;  %v461_v31 = vld [vmem:[%s735_s2 + $0x58] sm:$0xff]  ;;  %v460_v32 = vld [vmem:[%s735_s2 + $0x50] sm:$0xff] }
  0x10   :  { %91 = vmatpush.msra.mxu1 %v68_v15  ;;  %116 = vmatpush.msra.mxu2 %v100_v27  ;;  %v459_v33 = vld [vmem:[%s735_s2 + $0x48] sm:$0xff]  ;;  %v458_v34 = vld [vmem:[%s735_s2 + $0x40] sm:$0xff]  ;;  %v468_v41 = vld [vmem:[%s733_s0 + $0x18] sm:$0xff] }
  0x11   :  { %185 = vmatpush.msrb.mxu0 %v447_v8  ;;  %215 = vmatpush.msrb.mxu3 %v451_v24  ;;  %v473_v42 = vld [vmem:[%s735_s2 + $0x78] sm:$0xff]  ;;  %v472_v43 = vld [vmem:[%s735_s2 + $0x70] sm:$0xff]  ;;  %v471_v44 = vld [vmem:[%s735_s2 + $0x68] sm:$0xff] }
  0x12   :  { %252 = vmatpush.msrb.mxu1 %v234_v16  ;;  %117 = vmatpush.msra.mxu2 %v99_v28  ;;  %v470_v45 = vld [vmem:[%s735_s2 + $0x60] sm:$0xff]  ;;  %v466_v46 = vld [vmem:[%s736_s3 + $0x58] sm:$0xff]  ;;  %v465_v47 = vld [vmem:[%s736_s3 + $0x50] sm:$0xff] }
  0x13   :  { %186 = vmatpush.msrb.mxu0 %v446_v9  ;;  %348 = vmatpush.msra.mxu3 %v330_v25  ;;  %v478_v48 = vld [vmem:[%s736_s3 + $0x78] sm:$0xff]  ;;  %v477_v49 = vld [vmem:[%s736_s3 + $0x70] sm:$0xff]  ;;  %v464_v51 = vld [vmem:[%s736_s3 + $0x48] sm:$0xff] }
  0x14   :  { %253 = vmatpush.msrb.mxu1 %v233_v18  ;;  %118 = vmatpush.msra.mxu2 %v98_v29  ;;  %v476_v52 = vld [vmem:[%s736_s3 + $0x68] sm:$0xff]  ;;  %v463_v53 = vld [vmem:[%s736_s3 + $0x40] sm:$0xff]  ;;  %vm703_vm4 = vmand %vm37_vm2, %vm38_vm3 }
  0x15   :  { %349 = vmatpush.msra.mxu3 %v329_v26  ;;  %308 = vmatpush.msra.mxu0 %v466_v46  ;;  %v475_v14 = vld [vmem:[%s736_s3 + $0x60] sm:$0xff]  ;;  %s555_s3 = smov [#allocation5]  }
  0x16   :  { %119 = vmatpush.msra.mxu2 %v97_v30  ;;  %s426_s15 = sshll.u32 %s555_s3, 4  ;;  %s427_s15 = int_to_ptr.vmem [resolvable:$true] %s426_s15 }
  0x17   :  { %309 = vmatpush.msra.mxu0 %v465_v47 }
  0x18   :  { %279 = vmatpush.msrb.mxu2 %v461_v31 }
  0x19   :  { %310 = vmatpush.msra.mxu0 %v464_v51 }
  0x1a   :  { %280 = vmatpush.msrb.mxu2 %v460_v32 }
  0x1b   :  { %311 = vmatpush.msra.mxu0 %v463_v53 }
  0x1c   :  { %281 = vmatpush.msrb.mxu2 %v459_v33 }
  0x1e   :  { %282 = vmatpush.msrb.mxu2 %v458_v34 }
  0x89   :  { %v64_v19 = vpop.f32.mrf.mxu0 }
  0x8a   :  { %v67_v20 = vmax.f32 %v64_v19, 0.0 }
  0x8c   :  { %442 = vmatmul.msk.f32.vlgmr.msra.gmra.mxu1 %vm72_vm1, %v67_v20 }
  0x8d   :  { %v159_v21 = vpop.f32.mrf.mxu3  ;;  %375 = vmatpush.msra.mxu1 %v473_v42 }
  0x8e   :  { %v162_v22 = vmax.f32 %v159_v21, 0.0 }
  0x8f   :  { %376 = vmatpush.msra.mxu1 %v472_v43 }
  0x90   :  { %450 = vmatmul.msk.f32.vlgmr.msrb.gmra.mxu0 %vm72_vm1, %v162_v22 }
  0x91   :  { %377 = vmatpush.msra.mxu1 %v471_v44 }
  0x93   :  { %378 = vmatpush.msra.mxu1 %v470_v45 }
  0x94   :  { %457 = vmatmul.msk.f32.vlgmr.msrb.gmra.mxu1 %vm43_vm0, %v456_v23 }
 0x109   :  { %v93_v35 = vpop.f32.mrf.mxu1 }
 0x10a   :  { %v96_v36 = vmax.f32 %v93_v35, 0.0 }
 0x10c   :  { %443 = vmatmul.msk.f32.vlgmr.msra.gmra.mxu2 %vm72_vm1, %v96_v36 }
 0x10d   :  { %v188_v37 = vpop.f32.mrf.mxu0  ;;  %404 = vmatpush.msra.mxu2 %v478_v48 }
 0x10e   :  { %v191_v38 = vmax.f32 %v188_v37, 0.0 }
 0x10f   :  { %405 = vmatpush.msra.mxu2 %v477_v49 }
 0x110   :  { %455 = vmatmul.msk.f32.vlgmr.msrb.gmra.mxu3 %vm72_vm1, %v191_v38 }
 0x111   :  { %v255_v39 = vpop.f32.mrf.mxu1  ;;  %406 = vmatpush.msra.mxu2 %v476_v52 }
 0x112   :  { %v258_v40 = vmax.f32 %v255_v39, 0.0 }
 0x113   :  { %407 = vmatpush.msra.mxu2 %v475_v14 }
 0x114   :  { %462 = vmatmul.msk.f32.vlgmr.msrb.gmra.mxu2 %vm72_vm1, %v258_v40 }
 0x118   :  { %469 = vmatmul.msk.f32.vlgmr.msra.gmra.mxu3 %vm43_vm0, %v468_v41 }
 0x18f   :  { %v121_v50 = vpop.f32.mrf.mxu2 }
 0x190   :  { %484 = vtanh.f32 %v121_v50 }
 0x193   :  { %v217_v54 = vpop.f32.mrf.mxu3 }
 0x194   :  { %486 = vtanh.f32 %v217_v54 }
 0x196   :  { %v485_v55 = vpop.eup %484 }
 0x197   :  { %v125_v56 = vadd.f32 1.0, %v485_v55  ;;  %v284_v57 = vpop.f32.mrf.mxu2 }
 0x198   :  { %v287_v58 = vmax.f32 %v284_v57, 0.0 }
 0x199   :  { %v126_v59 = vmul.f32 6.0, %v125_v56 }
 0x19a   :  { %467 = vmatmul.msk.f32.vlgmr.msra.gmra.mxu0 %vm72_vm1, %v287_v58  ;;  %v487_v61 = vpop.eup %486 }
 0x19b   :  { %v127_v62 = vadd.f32 -10.0, %v126_v59  ;;  %v221_v63 = vadd.f32 1.0, %v487_v61  ;;  %v351_v0 = vpop.f32.mrf.mxu3 }
 0x19c   :  { %v354_v1 = vmax.f32 %v351_v0, 0.0 }
 0x19d   :  { %v128_v2 = vmul.f32 1.442695, %v127_v62  ;;  %v222_v4 = vmul.f32 6.0, %v221_v63 }
 0x19e   :  { %474 = vmatmul.msk.f32.vlgmr.msra.gmra.mxu1 %vm72_vm1, %v354_v1 }
 0x19f   :  { %488 = vpow2.f32 %v128_v2  ;;  %v223_v5 = vadd.f32 -10.0, %v222_v4 }
 0x1a1   :  { %v224_v6 = vmul.f32 1.442695, %v223_v5 }
 0x1a3   :  { %490 = vpow2.f32 %v224_v6 }
 0x1a5   :  { %v489_v7 = vpop.eup %488 }
 0x1a6   :  { %v130_v9 = vsel %vm703_vm4, %v489_v7, %v485_v55 }
 0x1a7   :  { %v131_v10 = vsel %vm36_vm5, %v121_v50, %v130_v9 }
 0x1a8   :  { %133 = vst.msk [vmem:[#allocation5] sm:$0xff] %vm132_vm6, %v131_v10 }
 0x1a9   :  { %v491_v11 = vpop.eup %490 }
 0x1aa   :  { %v226_v12 = vsel %vm703_vm4, %v491_v11, %v487_v61 }
 0x1ab   :  { %v227_v13 = vsel %vm36_vm5, %v217_v54, %v226_v12 }
 0x1ac   :  { %229 = vst.msk [vmem:[#allocation5 + $0x8] sm:$0xff] %vm132_vm6, %v227_v13 }
 0x217   :  { %v313_v15 = vpop.f32.mrf.mxu0 }
 0x218   :  { %492 = vtanh.f32 %v313_v15 }
 0x21b   :  { %v380_v16 = vpop.f32.mrf.mxu1 }
 0x21c   :  { %v383_v17 = vmax.f32 %v380_v16, 0.0 }
 0x21e   :  { %v493_v18 = vpop.eup %492  ;;  %479 = vmatmul.msk.f32.vlgmr.msra.gmra.mxu2 %vm72_vm1, %v383_v17 }
 0x21f   :  { %v317_v19 = vadd.f32 1.0, %v493_v18 }
 0x221   :  { %v318_v20 = vmul.f32 6.0, %v317_v19 }
 0x223   :  { %v319_v21 = vadd.f32 -10.0, %v318_v20 }
 0x225   :  { %v320_v22 = vmul.f32 1.442695, %v319_v21 }
 0x227   :  { %494 = vpow2.f32 %v320_v22 }
 0x22d   :  { %v495_v23 = vpop.eup %494 }
 0x22e   :  { %v322_v24 = vsel %vm703_vm4, %v495_v23, %v493_v18 }
 0x22f   :  { %v323_v25 = vsel %vm36_vm5, %v313_v15, %v322_v24 }
 0x230   :  { %325 = vst.msk [vmem:[#allocation5 + $0x10] sm:$0xff] %vm132_vm6, %v323_v25 }
 0x2a1   :  { %v409_v26 = vpop.f32.mrf.mxu2 }
 0x2a2   :  { %496 = vtanh.f32 %v409_v26 }
 0x2a8   :  { %v497_v27 = vpop.eup %496 }
 0x2a9   :  { %v413_v28 = vadd.f32 1.0, %v497_v27 }
 0x2ab   :  { %v414_v29 = vmul.f32 6.0, %v413_v28 }
 0x2ad   :  { %v415_v30 = vadd.f32 -10.0, %v414_v29 }
 0x2af   :  { %v416_v31 = vmul.f32 1.442695, %v415_v30 }
 0x2b1   :  { %498 = vpow2.f32 %v416_v31 }
 0x2b7   :  { %v499_v32 = vpop.eup %498 }
 0x2b8   :  { %v418_v33 = vsel %vm703_vm4, %v499_v32, %v497_v27 }
 0x2b9   :  { %v419_v34 = vsel %vm36_vm5, %v409_v26, %v418_v33 }
 0x2ba   :  { %421 = vst.msk [vmem:[#allocation5 + $0x18] sm:$0xff] %vm132_vm6, %v419_v34 }
 0x2bb   :  { %434 = dma.vmem_to_hbm [thread:$0]  %s427_s15, 512, %s429_s18, [#allocation4], %s553_s20, %s553_s20, %s554_s21  }
 0x2bc   :  { %550 = dma.done.wait [#allocation4], 512  }
 0x2bd   :  { %551 = vsyncadd [#allocation4], 4294966784 }
 0x2be   :  { %439 = vsyncpa [#allocation3], 1 }
 0x2bf   :  { %440 = vsyncpa [#allocation4], 1 }

</bundles_post_ra>
